<compile_context>
chip_gen: v5e
topology: v5e:2x2
jax: 0.10.0
libtpu: 0.0.40
codegen_flags: <defaults>
</compile_context>

<pallas_src>
import jax
import jax.numpy as jnp
from jax.experimental import pallas as pl
from jax.experimental.pallas import tpu as pltpu


_VMEM_TILE_BUDGET = 40 * 1024 * 1024  # conservative: fits v7x's 64 MiB physical VMEM


def _round_up(n, m):
    return (n + m - 1) // m * m


def _cdiv(a, b):
    return (a + b - 1) // b


# --------------------------------------------------------------------------
# Kernel: one (batch-tile, hidden-tile) step of Linear->ReLU->Linear->Sigmoid
# --------------------------------------------------------------------------
def _mlp_kernel(x_ref, w1_ref, b1_ref, w2_ref, b2_ref, o_ref, acc_ref):
    k = pl.program_id(1)

    @pl.when(k == 0)
    def _():
        acc_ref[...] = jnp.zeros_like(acc_ref)

    # Hidden slice: h_k = relu(x @ W1[:, k_tile] + b1[k_tile]); f32 MXU acc.
    h = jnp.dot(x_ref[...], w1_ref[...], preferred_element_type=jnp.float32)
    h = jnp.maximum(h + b1_ref[...], 0.0)

    # Second matmul in the weights' dtype (bf16 fast path or f32), f32 acc.
    acc_ref[...] += jnp.dot(h.astype(w2_ref.dtype), w2_ref[...],
                            preferred_element_type=jnp.float32)

    @pl.when(k == pl.num_programs(1) - 1)
    def _():
        o_ref[...] = jax.nn.sigmoid(acc_ref[...] + b2_ref[...]).astype(o_ref.dtype)


# --------------------------------------------------------------------------
# One-time parameter preparation (pad + optional bf16 cast, OUTSIDE hot path)
# --------------------------------------------------------------------------
def prepare_params(w1, b1, w2, b2, *, bf16_threshold=256):
    """Pad every feature dim to a multiple of 128 and (optionally) cast the
    matmul operands to bf16, exactly once.  Biases stay f32 (they are added
    to the f32 MXU accumulation)."""
    in_features, hidden = w1.shape
    out_features = w2.shape[1]
    in_p = _round_up(in_features, 128)
    hid_p = _round_up(hidden, 128)
    out_p = _round_up(out_features, 128)

    # bf16 matmul inputs pay off once the contraction dims are sizeable — on
    # every generation (v5e MXU is bf16-native + lowest HBM BW).  Tiny shapes
    # stay f32 and match the fp32 reference exactly.
    use_bf16 = min(in_features, hidden) >= bf16_threshold
    wdt = jnp.bfloat16 if use_bf16 else jnp.float32

    w1p = jnp.pad(w1.astype(wdt), ((0, in_p - in_features), (0, hid_p - hidden)))
    w2p = jnp.pad(w2.astype(wdt), ((0, hid_p - hidden), (0, out_p - out_features)))
    b1p = jnp.pad(b1.astype(jnp.float32), ((0, 0), (0, hid_p - hidden)))
    b2p = jnp.pad(b2.astype(jnp.float32), ((0, 0), (0, out_p - out_features)))

    meta = dict(in_features=in_features, hidden=hidden, out_features=out_features,
                in_p=in_p, hid_p=hid_p, out_p=out_p, use_bf16=use_bf16)
    return (w1p, b1p, w2p, b2p), meta


# --------------------------------------------------------------------------
# Tile selection
# --------------------------------------------------------------------------
def _pick_tiles(batch, meta, block_batch, vmem_budget_bytes):
    in_p, hid_p, out_p = meta["in_p"], meta["hid_p"], meta["out_p"]
    wbytes = 2 if meta["use_bf16"] else 4

    b8 = _round_up(batch, 8)
    # Cap per-step rows at block_batch; use >=2 batch steps when the batch
    # permits so ("parallel", ...) shards the grid across v7x's two TCs, and
    # size the tile so batch-padding waste stays minimal.
    n_b = max(1, _cdiv(b8, block_batch))
    if n_b == 1 and b8 >= 16:
        n_b = 2
    tb = _round_up(_cdiv(b8, n_b), 8)

    def est_vmem(tb_, tk_):
        n_k_ = hid_p // tk_
        wbuf = 1 if n_k_ == 1 else 2          # constant-index blocks: 1 buffer
        w = ((in_p * tk_ + tk_ * out_p) * wbytes + tk_ * 4) * wbuf + out_p * 4
        act = tb_ * in_p * wbytes * 2 + tb_ * out_p * 4 * 2 + tb_ * out_p * 4
        return w + act

    # Largest hidden tile (multiple of 128 dividing hid_p) whose weight slabs
    # + activation tiles fit the budget.  On v7x (64 MiB VMEM) the "weights
    # fully resident" regime ends ~2x earlier than on v5e/v6e; then we fall
    # back to tiling the hidden dim (accumulator pattern in the kernel).
    divisors = [d for d in range(hid_p, 127, -128) if hid_p % d == 0]
    tk = divisors[-1]
    for d in divisors:
        if est_vmem(tb, d) <= vmem_budget_bytes:
            tk = d
            break
    while est_vmem(tb, tk) > vmem_budget_bytes and tb > 8:
        tb = max(8, _round_up(tb // 2, 8))

    n_k = hid_p // tk
    n_b = _cdiv(b8, tb)
    return tb, n_b, tk, n_k, est_vmem(tb, tk)


def _spec(shape, index_map, single_buffer):
    """BlockSpec; constant-index blocks request a single pipeline buffer."""
    if single_buffer:
        try:
            return pl.BlockSpec(shape, index_map, pipeline_mode=pl.Buffered(1))
        except TypeError:  # pipeline_mode kwarg unavailable -> default buffering
            pass
    return pl.BlockSpec(shape, index_map)


# --------------------------------------------------------------------------
# Forward wrapper
# --------------------------------------------------------------------------
def custom_model_forward(x, params, meta, *, block_batch=512,
                         vmem_budget_bytes=_VMEM_TILE_BUDGET,
                         out_dtype=jnp.float32):
    """Fused MLP forward: sigmoid(relu(x @ W1 + b1) @ W2 + b2).

    `params`/`meta` come from prepare_params() (weights padded/cast once).
    x: [B, in_features] float32.  Returns [B, out_features] in out_dtype.
    """
    w1p, b1p, w2p, b2p = params
    batch, in_features = x.shape
    assert in_features == meta["in_features"]
    in_p, out_p = meta["in_p"], meta["out_p"]
    out_features = meta["out_features"]

    tb, n_b, tk, n_k, est = _pick_tiles(batch, meta, block_batch,
                                        vmem_budget_bytes)
    batch_p = tb * n_b

    # Single pad (and cast on the bf16 fast path); no zeros+scatter passes.
    xp = jnp.pad(x.astype(w1p.dtype),
                 ((0, batch_p - batch), (0, in_p - in_features)))

    single_w = (n_k == 1)   # weights fetched exactly once -> single buffer
    in_specs = [
        pl.BlockSpec((tb, in_p), lambda i, k: (i, 0)),            # x (batch-tiled)
        _spec((in_p, tk), lambda i, k: (0, k), single_w),          # W1
        _spec((1, tk), lambda i, k: (0, k), single_w),             # b1
        _spec((tk, out_p), lambda i, k: (k, 0), single_w),         # W2
        _spec((1, out_p), lambda i, k: (0, 0), True),              # b2 (always const)
    ]

    # Explicit scoped-VMEM limit (defaults are only 16/32 MiB); clamp to the
    # smallest physical VMEM across targets (v7x: 64 MiB).
    vmem_limit = int(min(max(est * 5 // 4 + (2 << 20), 32 << 20), 64 << 20))

    out_padded = pl.pallas_call(
        _mlp_kernel,
        out_shape=jax.ShapeDtypeStruct((batch_p, out_p), out_dtype),
        grid_spec=pltpu.PrefetchScalarGridSpec(
            num_scalar_prefetch=0,
            grid=(n_b, n_k),                      # reduction (hidden) axis last
            in_specs=in_specs,
            out_specs=pl.BlockSpec((tb, out_p), lambda i, k: (i, 0)),
            scratch_shapes=[pltpu.VMEM((tb, out_p), jnp.float32)],
        ),
        compiler_params=pltpu.CompilerParams(
            dimension_semantics=("parallel", "arbitrary"),
            vmem_limit_bytes=vmem_limit,
        ),
    )(xp, w1p, b1p, w2p, b2p)

    return out_padded[:batch, :out_features]


# --------------------------------------------------------------------------
# Init + reference
# --------------------------------------------------------------------------
def init_params(key, input_size, hidden, out_features):
    """Deterministic init mimicking PyTorch nn.Linear default (U[-1/sqrt(fan_in), +])."""
    k1, k2, k3, k4 = jax.random.split(key, 4)
    lim1 = 1.0 / jnp.sqrt(jnp.float32(input_size))
    lim2 = 1.0 / jnp.sqrt(jnp.float32(hidden))
    # stored directly as [in, out] (i.e. PyTorch W.T)
    w1 = jax.random.uniform(k1, (input_size, hidden), jnp.float32, -lim1, lim1)
    b1 = jax.random.uniform(k2, (1, hidden), jnp.float32, -lim1, lim1)
    w2 = jax.random.uniform(k3, (hidden, out_features), jnp.float32, -lim2, lim2)
    b2 = jax.random.uniform(k4, (1, out_features), jnp.float32, -lim2, lim2)
    return w1, b1, w2, b2


def reference_forward(x, w1, b1, w2, b2):
    """Pure-JAX reference matching nn.Sequential(Linear, ReLU, Linear, Sigmoid)."""
    h = jnp.maximum(x @ w1 + b1, 0.0)
    return jax.nn.sigmoid(h @ w2 + b2)


if __name__ == "__main__":
    key = jax.random.PRNGKey(0)
    kx, kp, kx2, kp2 = jax.random.split(key, 4)

    # --- Test 1: small "reverse binary" shapes (exact f32 path) ------------
    batch, input_size, hidden = 8, 8, 32
    out_features = input_size  # the model outputs the reversed bit-string
    x = jax.random.bernoulli(kx, 0.5, (batch, input_size)).astype(jnp.float32)
    w1, b1, w2, b2 = init_params(kp, input_size, hidden, out_features)
    params, meta = prepare_params(w1, b1, w2, b2)

    out = jax.block_until_ready(custom_model_forward(x, params, meta))
    ref = reference_forward(x, w1, b1, w2, b2)
    assert out.shape == (batch, out_features)
    assert jnp.allclose(out, ref, atol=1e-5, rtol=1e-5)

    # --- Test 2: bf16 fast path + >=2 batch tiles (megacore sharding) ------
    batch2, in2, hid2 = 64, 256, 512
    x2 = jax.random.normal(kx2, (batch2, in2), jnp.float32)
    w1b, b1b, w2b, b2b = init_params(kp2, in2, hid2, in2)
    params2, meta2 = prepare_params(w1b, b1b, w2b, b2b)
    out2 = jax.block_until_ready(custom_model_forward(x2, params2, meta2))
    ref2 = reference_forward(x2, w1b, b1b, w2b, b2b)
    assert jnp.allclose(out2, ref2, atol=2e-2, rtol=2e-2)

    # --- Test 3: force the hidden-dim-tiled accumulator path ---------------
    out3 = jax.block_until_ready(
        custom_model_forward(x2, params2, meta2, vmem_budget_bytes=300_000))
    assert jnp.allclose(out3, ref2, atol=2e-2, rtol=2e-2)

    print("KERNEL_OK")
</pallas_src>

<mosaic_0001>
module attributes {stable_mosaic.version = 11 : i64} {
  func.func @_mlp_kernel(%arg0: i32, %arg1: i32, %arg2: memref<8x128xf32, #tpu.memory_space<vmem>>, %arg3: memref<128x128xf32, #tpu.memory_space<vmem>>, %arg4: memref<1x128xf32, #tpu.memory_space<vmem>>, %arg5: memref<128x128xf32, #tpu.memory_space<vmem>>, %arg6: memref<1x128xf32, #tpu.memory_space<vmem>>, %arg7: memref<8x128xf32, #tpu.memory_space<vmem>>, %arg8: memref<8x128xf32, #tpu.memory_space<vmem>>) attributes {dimension_semantics = [#tpu.dimension_semantics<parallel>, #tpu.dimension_semantics<arbitrary>], iteration_bounds = array<i64: 1, 1>, scalar_prefetch = 0 : i64, scratch_operands = 1 : i64, tpu.core_type = #tpu.core_type<tc>, window_params = [{transform_indices = @transform_0, window_bounds = array<i64: 8, 128>}, {pipeline_mode = #tpu.pipeline_mode<synchronous>, transform_indices = @transform_1, window_bounds = array<i64: 128, 128>}, {pipeline_mode = #tpu.pipeline_mode<synchronous>, transform_indices = @transform_2, window_bounds = array<i64: 1, 128>}, {pipeline_mode = #tpu.pipeline_mode<synchronous>, transform_indices = @transform_3, window_bounds = array<i64: 128, 128>}, {pipeline_mode = #tpu.pipeline_mode<synchronous>, transform_indices = @transform_4, window_bounds = array<i64: 1, 128>}, {transform_indices = @transform_5, window_bounds = array<i64: 8, 128>}]} {
    %c0_i32 = arith.constant 0 : i32
    %0 = arith.cmpi eq, %arg1, %c0_i32 : i32
    %1 = arith.extui %0 : i1 to i32
    %c0_i32_0 = arith.constant 0 : i32
    %2 = arith.cmpi ne, %1, %c0_i32_0 : i32
    scf.if %2 {
      %cst_16 = arith.constant 0.000000e+00 : f32
      %19 = vector.broadcast %cst_16 : f32 to vector<8x128xf32>
      %c0_17 = arith.constant 0 : index
      %c0_18 = arith.constant 0 : index
      %20 = vector.load %arg8[%c0_17, %c0_18] : memref<8x128xf32, #tpu.memory_space<vmem>>, vector<8x128xf32>
      tpu.vector_store %arg8[%c0_17, %c0_18], %19 {strides = array<i32>} : memref<8x128xf32, #tpu.memory_space<vmem>>, vector<8x128xf32>,
    } else {
    }
    %c0 = arith.constant 0 : index
    %c0_1 = arith.constant 0 : index
    %3 = vector.load %arg2[%c0, %c0_1] : memref<8x128xf32, #tpu.memory_space<vmem>>, vector<8x128xf32>
    %c0_2 = arith.constant 0 : index
    %c0_3 = arith.constant 0 : index
    %4 = vector.load %arg3[%c0_2, %c0_3] : memref<128x128xf32, #tpu.memory_space<vmem>>, vector<128x128xf32>
    %cst = arith.constant dense<0.000000e+00> : vector<8x128xf32>
    %5 = tpu.matmul %3, %4, %cst {dimension_numbers = #tpu.dot_dimension_numbers<[1], [0], [0], [1], [0, 0, 1, 1], [], []>} : vector<8x128xf32>, vector<128x128xf32>, vector<8x128xf32> -> vector<8x128xf32>
    %c0_4 = arith.constant 0 : index
    %c0_5 = arith.constant 0 : index
    %6 = vector.load %arg4[%c0_4, %c0_5] : memref<1x128xf32, #tpu.memory_space<vmem>>, vector<1x128xf32>
    %7 = vector.broadcast %6 : vector<1x128xf32> to vector<8x128xf32>
    %8 = arith.addf %5, %7 : vector<8x128xf32>
    %cst_6 = arith.constant 0.000000e+00 : f32
    %9 = vector.broadcast %cst_6 : f32 to vector<8x128xf32>
    %10 = arith.maximumf %8, %9 : vector<8x128xf32>
    %c0_7 = arith.constant 0 : index
    %c0_8 = arith.constant 0 : index
    %11 = vector.load %arg8[%c0_7, %c0_8] : memref<8x128xf32, #tpu.memory_space<vmem>>, vector<8x128xf32>
    %c0_9 = arith.constant 0 : index
    %c0_10 = arith.constant 0 : index
    %12 = vector.load %arg5[%c0_9, %c0_10] : memref<128x128xf32, #tpu.memory_space<vmem>>, vector<128x128xf32>
    %cst_11 = arith.constant dense<0.000000e+00> : vector<8x128xf32>
    %13 = tpu.matmul %10, %12, %cst_11 {dimension_numbers = #tpu.dot_dimension_numbers<[1], [0], [0], [1], [0, 0, 1, 1], [], []>} : vector<8x128xf32>, vector<128x128xf32>, vector<8x128xf32> -> vector<8x128xf32>
    %14 = arith.addf %11, %13 : vector<8x128xf32>
    %c0_12 = arith.constant 0 : index
    %c0_13 = arith.constant 0 : index
    %15 = vector.load %arg8[%c0_12, %c0_13] : memref<8x128xf32, #tpu.memory_space<vmem>>, vector<8x128xf32>
    tpu.vector_store %arg8[%c0_12, %c0_13], %14 {strides = array<i32>} : memref<8x128xf32, #tpu.memory_space<vmem>>, vector<8x128xf32>,
    %c0_i32_14 = arith.constant 0 : i32
    %16 = arith.cmpi eq, %arg1, %c0_i32_14 : i32
    %17 = arith.extui %16 : i1 to i32
    %c0_i32_15 = arith.constant 0 : i32
    %18 = arith.cmpi ne, %17, %c0_i32_15 : i32
    scf.if %18 {
      %c0_16 = arith.constant 0 : index
      %c0_17 = arith.constant 0 : index
      %19 = vector.load %arg8[%c0_16, %c0_17] : memref<8x128xf32, #tpu.memory_space<vmem>>, vector<8x128xf32>
      %c0_18 = arith.constant 0 : index
      %c0_19 = arith.constant 0 : index
      %20 = vector.load %arg6[%c0_18, %c0_19] : memref<1x128xf32, #tpu.memory_space<vmem>>, vector<1x128xf32>
      %21 = vector.broadcast %20 : vector<1x128xf32> to vector<8x128xf32>
      %22 = arith.addf %19, %21 : vector<8x128xf32>
      %23 = arith.negf %22 : vector<8x128xf32>
      %24 = math.exp %23 : vector<8x128xf32>
      %cst_20 = arith.constant 1.000000e+00 : f32
      %25 = vector.broadcast %cst_20 : f32 to vector<8x128xf32>
      %26 = arith.addf %25, %24 : vector<8x128xf32>
      %27 = arith.divf %25, %26 : vector<8x128xf32>
      %c0_21 = arith.constant 0 : index
      %c0_22 = arith.constant 0 : index
      %28 = vector.load %arg7[%c0_21, %c0_22] : memref<8x128xf32, #tpu.memory_space<vmem>>, vector<8x128xf32>
      tpu.vector_store %arg7[%c0_21, %c0_22], %27 {strides = array<i32>} : memref<8x128xf32, #tpu.memory_space<vmem>>, vector<8x128xf32>,
    } else {
    }
    return
  }
  func.func @transform_0(%arg0: i32, %arg1: i32) -> (i32, i32) {
    %c0_i32 = arith.constant 0 : i32
    %c0_i32_0 = arith.constant 0 : i32
    return %arg0, %c0_i32 : i32, i32
  }
  func.func @transform_1(%arg0: i32, %arg1: i32) -> (i32, i32) {
    %c0_i32 = arith.constant 0 : i32
    %c0_i32_0 = arith.constant 0 : i32
    return %c0_i32, %arg1 : i32, i32
  }
  func.func @transform_2(%arg0: i32, %arg1: i32) -> (i32, i32) {
    %c0_i32 = arith.constant 0 : i32
    %c0_i32_0 = arith.constant 0 : i32
    return %c0_i32, %arg1 : i32, i32
  }
  func.func @transform_3(%arg0: i32, %arg1: i32) -> (i32, i32) {
    %c0_i32 = arith.constant 0 : i32
    %c0_i32_0 = arith.constant 0 : i32
    return %arg1, %c0_i32 : i32, i32
  }
  func.func @transform_4(%arg0: i32, %arg1: i32) -> (i32, i32) {
    %c0_i32 = arith.constant 0 : i32
    %c0_i32_0 = arith.constant 0 : i32
    %c0_i32_1 = arith.constant 0 : i32
    return %c0_i32, %c0_i32_0 : i32, i32
  }
  func.func @transform_5(%arg0: i32, %arg1: i32) -> (i32, i32) {
    %c0_i32 = arith.constant 0 : i32
    %c0_i32_0 = arith.constant 0 : i32
    return %arg0, %c0_i32 : i32, i32
  }
}

</mosaic_0001>

<bundles_post_ra>
// kernel: tpu_custom_call.1
= control target key start
LH: loop header
LB: loop body
LE: loop exit
PB: predicated region body
PF: predicated region fallthrough
CT: control target
= control target key end

     0   :  { %10 = vsyncpa [#allocation4], 0  ;;  %s368_s0 = inlined_call_operand.hbm [shape: f32[8,128], index: 0, kind: input, shape index: {}]   ;;  %s369_s1 = inlined_call_operand.hbm [shape: f32[128,128], index: 1, kind: input, shape index: {}]   ;;  %s370_s2 = inlined_call_operand.vmem [shape: f32[1,128], index: 2, kind: input, shape index: {}]   ;;  %s371_s3 = inlined_call_operand.hbm [shape: f32[128,128], index: 3, kind: input, shape index: {}]   ;;  %s372_s4 = inlined_call_operand.vmem [shape: f32[1,128], index: 4, kind: input, shape index: {}]   ;;  %s373_s5 = inlined_call_operand.hbm [shape: f32[8,128], index: 5, kind: output, shape index: {}]  }
   0x1   :  { %11 = vsyncpa [#allocation7], 0  ;;  %s28_s20 = sshll.u32 %s369_s1, 4  ;;  %s29_s20 = int_to_ptr.hbm [resolvable:$true] %s28_s20 }
   0x2   :  { %12 = vsyncpa [#allocation5], 0  ;;  %s314_s21 = smov [#allocation6]   ;;  %s18_s25 = sshll.u32 %s368_s0, 4  ;;  %s19_s25 = int_to_ptr.hbm [resolvable:$true] %s18_s25 }
   0x3   :  { %s30_s22 = sshll.u32 %s314_s21, 4  ;;  %s315_s26 = smov 128   ;;  %s31_s22 = int_to_ptr.vmem [resolvable:$true] %s30_s22 }
   0x4   :  { %s316_s27 = smov 8   ;;  %s317_s28 = smov [#allocation3]  }
   0x5   :  { %36 = dma.hbm_to_vmem [thread:$0]  %s29_s20, 2048, %s31_s22, [#allocation7], %s315_s26, %s315_s26, %s316_s27  }
   0x6   :  { %s20_s29 = sshll.u32 %s317_s28, 4  ;;  %s43_s7 = sshll.u32 %s371_s3, 4  ;;  %s21_s29 = int_to_ptr.vmem [resolvable:$true] %s20_s29  ;;  %s44_s7 = int_to_ptr.hbm [resolvable:$true] %s43_s7 }
   0x7   :  { %23 = dma.hbm_to_vmem [thread:$0]  %s19_s25, 128, %s21_s29, [#allocation4]  }
   0x8   :  { %s318_s1 = smov [#allocation8]  }
   0x9   :  { %s45_s8 = sshll.u32 %s318_s1, 4  ;;  %s46_s8 = int_to_ptr.vmem [resolvable:$true] %s45_s8 }
   0xa   :  { %51 = dma.hbm_to_vmem [thread:$0]  %s44_s7, 2048, %s46_s8, [#allocation7], %s315_s26, %s315_s26, %s316_s27  }
   0xb   :  { %308 = dma.done.wait [#allocation4], 128  }
   0xc   :  { %309 = vsyncadd [#allocation4], 4294967168 }
   0xd   :  { %310 = dma.done.wait [#allocation7], 4096  }
   0xe   :  { %311 = vsyncadd [#allocation7], 4294963200  ;;  %v87_v0 = vld [vmem:[#allocation6 + $0x78] sm:$0xff]  ;;  %v86_v1 = vld [vmem:[#allocation6 + $0x70] sm:$0xff] }
   0xf   :  { %92 = vmatpush.msra.mxu0 %v87_v0  ;;  %v85_v2 = vld [vmem:[#allocation6 + $0x68] sm:$0xff]  ;;  %v84_v3 = vld [vmem:[#allocation6 + $0x60] sm:$0xff]  ;;  %v129_v4 = vld [vmem:[#allocation8 + $0x78] sm:$0xff] }
  0x10   :  { %v83_v5 = vld [vmem:[#allocation6 + $0x58] sm:$0xff]  ;;  %130 = vmatpush.msra.mxu1 %v129_v4  ;;  %v128_v6 = vld [vmem:[#allocation8 + $0x70] sm:$0xff]  ;;  %v127_v7 = vld [vmem:[#allocation8 + $0x68] sm:$0xff] }
  0x11   :  { %93 = vmatpush.msra.mxu0 %v86_v1  ;;  %v82_v8 = vld [vmem:[#allocation6 + $0x50] sm:$0xff]  ;;  %v126_v9 = vld [vmem:[#allocation8 + $0x60] sm:$0xff]  ;;  %v81_v10 = vld [vmem:[#allocation6 + $0x48] sm:$0xff] }
  0x12   :  { %131 = vmatpush.msra.mxu1 %v128_v6  ;;  %v125_v11 = vld [vmem:[#allocation8 + $0x58] sm:$0xff]  ;;  %v80_v12 = vld [vmem:[#allocation6 + $0x40] sm:$0xff]  ;;  %v124_v13 = vld [vmem:[#allocation8 + $0x50] sm:$0xff] }
  0x13   :  { %94 = vmatpush.msra.mxu0 %v85_v2  ;;  %v79_v14 = vld [vmem:[#allocation6 + $0x38] sm:$0xff]  ;;  %v123_v15 = vld [vmem:[#allocation8 + $0x48] sm:$0xff]  ;;  %v78_v16 = vld [vmem:[#allocation6 + $0x30] sm:$0xff] }
  0x14   :  { %132 = vmatpush.msra.mxu1 %v127_v7  ;;  %v122_v17 = vld [vmem:[#allocation8 + $0x40] sm:$0xff]  ;;  %v77_v18 = vld [vmem:[#allocation6 + $0x28] sm:$0xff]  ;;  %v121_v19 = vld [vmem:[#allocation8 + $0x38] sm:$0xff] }
  0x15   :  { %95 = vmatpush.msra.mxu0 %v84_v3  ;;  %v76_v20 = vld [vmem:[#allocation6 + $0x20] sm:$0xff]  ;;  %v120_v21 = vld [vmem:[#allocation8 + $0x30] sm:$0xff]  ;;  %v75_v22 = vld [vmem:[#allocation6 + $0x18] sm:$0xff] }
  0x16   :  { %133 = vmatpush.msra.mxu1 %v126_v9  ;;  %v119_v23 = vld [vmem:[#allocation8 + $0x28] sm:$0xff]  ;;  %v74_v24 = vld [vmem:[#allocation6 + $0x10] sm:$0xff]  ;;  %v118_v25 = vld [vmem:[#allocation8 + $0x20] sm:$0xff] }
  0x17   :  { %96 = vmatpush.msra.mxu0 %v83_v5  ;;  %v73_v26 = vld [vmem:[#allocation6 + $0x8] sm:$0xff]  ;;  %v117_v27 = vld [vmem:[#allocation8 + $0x18] sm:$0xff]  ;;  %v72_v28 = vld [vmem:[#allocation6] sm:$0xff] }
  0x18   :  { %134 = vmatpush.msra.mxu1 %v125_v11  ;;  %v71_v29 = vld [vmem:[#allocation3] sm:$0xff]  ;;  %v116_v30 = vld [vmem:[#allocation8 + $0x10] sm:$0xff]  ;;  %v115_v31 = vld [vmem:[#allocation8 + $0x8] sm:$0xff] }
  0x19   :  { %97 = vmatpush.msra.mxu0 %v82_v8  ;;  %v114_v32 = vld [vmem:[#allocation8] sm:$0xff]  ;;  %v206_v33 = vld [vmem:[%s370_s2] ss:$0 sm:$0xff]  ;;  %s319_s2 = smov [#allocation9]  }
  0x1a   :  { %135 = vmatpush.msra.mxu1 %v124_v13  ;;  %v207_v37 = vld [vmem:[%s372_s4] ss:$0 sm:$0xff]  ;;  %s186_s11 = sshll.u32 %s319_s2, 4  ;;  %s188_s4 = sshll.u32 %s373_s5, 4  ;;  %s187_s11 = int_to_ptr.vmem [resolvable:$true] %s186_s11  ;;  %s189_s4 = int_to_ptr.hbm [resolvable:$true] %s188_s4 }
  0x1b   :  { %98 = vmatpush.msra.mxu0 %v81_v10 }
  0x1c   :  { %136 = vmatpush.msra.mxu1 %v123_v15 }
  0x1d   :  { %99 = vmatpush.msra.mxu0 %v80_v12 }
  0x1e   :  { %137 = vmatpush.msra.mxu1 %v122_v17 }
  0x1f   :  { %100 = vmatpush.msra.mxu0 %v79_v14 }
  0x20   :  { %138 = vmatpush.msra.mxu1 %v121_v19 }
  0x21   :  { %101 = vmatpush.msra.mxu0 %v78_v16 }
  0x22   :  { %139 = vmatpush.msra.mxu1 %v120_v21 }
  0x23   :  { %102 = vmatpush.msra.mxu0 %v77_v18 }
  0x24   :  { %140 = vmatpush.msra.mxu1 %v119_v23 }
  0x25   :  { %103 = vmatpush.msra.mxu0 %v76_v20 }
  0x26   :  { %141 = vmatpush.msra.mxu1 %v118_v25 }
  0x27   :  { %104 = vmatpush.msra.mxu0 %v75_v22 }
  0x28   :  { %142 = vmatpush.msra.mxu1 %v117_v27 }
  0x29   :  { %105 = vmatpush.msra.mxu0 %v74_v24 }
  0x2a   :  { %143 = vmatpush.msra.mxu1 %v116_v30 }
  0x2b   :  { %106 = vmatpush.msra.mxu0 %v73_v26 }
  0x2c   :  { %144 = vmatpush.msra.mxu1 %v115_v31 }
  0x2d   :  { %107 = vmatpush.msra.mxu0 %v72_v28 }
  0x2e   :  { %108 = vmatmul.f32.vlgmr.msra.gmra.mxu0 %v71_v29  ;;  %145 = vmatpush.msra.mxu1 %v114_v32 }
  0xab   :  { %v109_v34 = vpop.f32.mrf.mxu0 }
  0xac   :  { %v110_v35 = vadd.f32 %v206_v33, %v109_v34 }
  0xae   :  { %v112_v36 = vmax.f32 %v110_v35, 0.0 }
  0xb0   :  { %146 = vmatmul.f32.vlgmr.msra.gmra.mxu1 %v112_v36 }
 0x12d   :  { %v147_v38 = vpop.f32.mrf.mxu1 }
 0x12e   :  { %v160_v39 = vadd.f32 %v207_v37, %v147_v38 }
 0x130   :  { %v199_v40 = vmul.f32 -1.442695, %v160_v39 }
 0x132   :  { %208 = vpow2.f32 %v199_v40 }
 0x138   :  { %v209_v41 = vpop.eup %208 }
 0x139   :  { %v164_v42 = vadd.f32 1.0, %v209_v41 }
 0x13b   :  { %210 = vrcp.f32 %v164_v42  ;;  %v176_v46 = vand.u32 2147483648, %v164_v42  ;;  %v174_v48 = vand.u32 2147483647, %v164_v42  ;;  %vm170_vm1 = vweird.f32 %v164_v42 }
 0x13d   :  { %v177_v50 = vor.u32 1.1754944e-38, %v176_v46  ;;  %vm175_vm3 = vcmp.eq.f32.partialorder %v174_v48, 8.507059e+37 }
 0x141   :  { %v211_v43 = vpop.eup %210 }
 0x142   :  { %v166_v44 = vmul.f32 %v211_v43, %v164_v42  ;;  %vm171_vm0 = vweird.f32 %v211_v43 }
 0x143   :  { %vm172_vm2 = vmor %vm170_vm1, %vm171_vm0 }
 0x144   :  { %v167_v45 = vsub.f32 1.0, %v166_v44 }
 0x146   :  { %v168_v47 = vmul.f32 %v211_v43, %v167_v45 }
 0x148   :  { %v169_v49 = vadd.f32 %v211_v43, %v168_v47 }
 0x14a   :  { %v173_v51 = vsel %vm172_vm2, %v211_v43, %v169_v49 }
 0x14b   :  { %v178_v52 = vsel %vm175_vm3, %v177_v50, %v173_v51 }
 0x14c   :  { %180 = vst [vmem:[#allocation9] sm:$0xff] %v178_v52 }
 0x14d   :  { %191 = dma.vmem_to_hbm [thread:$0]  %s187_s11, 128, %s189_s4, [#allocation5]  }
 0x14e   :  { %312 = dma.done.wait [#allocation5], 128  }
 0x14f   :  { %313 = vsyncadd [#allocation5], 4294967168 }
 0x150   :  { %196 = vsyncpa [#allocation4], 1 }
 0x151   :  { %197 = vsyncpa [#allocation7], 1 }
 0x152   :  { %198 = vsyncpa [#allocation5], 1 }

</bundles_post_ra>
